<compile_context>
chip_gen: v7x
topology: tpu7x:2x2x1
jax: 0.10.0
libtpu: 0.0.40
codegen_flags: <defaults>
</compile_context>

<pallas_src>
import functools

import jax
import jax.numpy as jnp
from jax import lax
from jax.experimental import pallas as pl
from jax.experimental.pallas import tpu as pltpu


# ----------------------------------------------------------------------------- kernels


def _bn_fused_kernel(x_ref, w_ref, b_ref, o_ref, *, eps, inv_count):
    """Single-pass batch norm for one channel tile.

    x_ref: (N, TC, L)   w_ref/b_ref: (TC, 1) float32   o_ref: (N, TC, L)
    """
    xf = x_ref[...].astype(jnp.float32)                                   # (N, TC, L)
    s = jnp.sum(jnp.sum(xf, axis=0), axis=1, keepdims=True)               # (TC, 1)
    sq = jnp.sum(jnp.sum(xf * xf, axis=0), axis=1, keepdims=True)         # (TC, 1)
    mean = s * inv_count
    var = jnp.maximum(sq * inv_count - mean * mean, 0.0)                  # biased var
    inv_std = lax.rsqrt(var + eps)
    scale = inv_std * w_ref[...]                                          # (TC, 1)
    shift = b_ref[...] - mean * scale                                     # (TC, 1)
    o_ref[...] = (xf * scale + shift).astype(o_ref.dtype)


def _bn_stats_kernel(x_ref, sum_ref, sq_ref, *, length, length_tile):
    """Accumulate per-channel sum / sum-of-squares over tiled length axis.

    Grid = (channel tiles [parallel], length tiles [arbitrary, last]).
    x_ref: (N, TC, TL)   sum_ref/sq_ref: (TC, 1) float32, resident across j.
    """
    j = pl.program_id(1)

    @pl.when(j == 0)
    def _():
        sum_ref[...] = jnp.zeros_like(sum_ref)
        sq_ref[...] = jnp.zeros_like(sq_ref)

    xf = x_ref[...].astype(jnp.float32)                                   # (N, TC, TL)
    # Mask the padded tail of the (possibly partial) last length tile so padded
    # elements cannot corrupt the statistics.
    col = lax.broadcasted_iota(jnp.int32, (1, length_tile), 1) + j * length_tile
    xf = jnp.where(col < length, xf, 0.0)

    sum_ref[...] += jnp.sum(jnp.sum(xf, axis=0), axis=1, keepdims=True)
    sq_ref[...] += jnp.sum(jnp.sum(xf * xf, axis=0), axis=1, keepdims=True)


def _bn_affine_kernel(x_ref, scale_ref, shift_ref, o_ref):
    """y = x * scale + shift with per-channel (TC, 1) scale/shift."""
    xf = x_ref[...].astype(jnp.float32)
    o_ref[...] = (xf * scale_ref[...] + shift_ref[...]).astype(o_ref.dtype)


# ----------------------------------------------------------------------------- sizing


def _tpu_vmem_bytes():
    try:
        return int(pltpu.get_tpu_info().vmem_capacity_bytes)
    except Exception:
        return 64 * 1024 * 1024  # conservative (v7x per-TC VMEM)


def _fused_channel_tile(n, c, l, itemsize, budget):
    # per-channel bytes of one pipelined step:
    #   double-buffered input + double-buffered output + ~1x f32 working set
    per_ch = n * l * (4 * itemsize + 4)
    max_tc = budget // max(per_ch, 1)
    if max_tc >= c:
        return c
    return int(max_tc // 8) * 8  # sublane constraint: multiple of 8 (0 -> no fit)


def _two_pass_tiles(n, c, l, itemsize, budget):
    tc = 8 if c >= 8 else c
    per_len = n * tc * (4 * itemsize + 4)
    tl = (int(budget // max(per_len, 1)) // 128) * 128
    tl = max(tl, 128)
    tl = min(tl, l)
    return tc, tl


# ----------------------------------------------------------------------------- wrapper


def meta_batch_norm1d(x, weight, bias, eps=1e-5, *,
                      two_pass=None, length_tile=None, vmem_budget_bytes=None):
    """x: (N, C, L). weight/bias: (C,). Returns (N, C, L) in x.dtype."""
    N, C, L = x.shape
    count = N * L
    inv_count = 1.0 / float(count)
    eps = float(eps)

    # Keep affine params in float32 (no precision loss, negligible bandwidth).
    w = weight.astype(jnp.float32).reshape(C, 1)
    b = bias.astype(jnp.float32).reshape(C, 1)

    itemsize = jnp.dtype(x.dtype).itemsize
    phys = _tpu_vmem_bytes()
    budget = (vmem_budget_bytes if vmem_budget_bytes is not None
              else max(8 << 20, int(phys * 0.35)))
    vmem_limit = max(32 << 20, min(int(phys * 3 // 4), 96 << 20))

    tc_fused = _fused_channel_tile(N, C, L, itemsize, budget)
    fused_ok = (tc_fused == C) or (tc_fused >= 8)
    use_two_pass = (not fused_ok) if two_pass is None else bool(two_pass)

    if not use_two_pass:
        # ---- fused single-pass path: whole (N, TC, L) slab per grid step -----
        tc = tc_fused if fused_ok else C
        grid = (pl.cdiv(C, tc),)
        kernel = functools.partial(_bn_fused_kernel, eps=eps, inv_count=inv_count)
        return pl.pallas_call(
            kernel,
            out_shape=jax.ShapeDtypeStruct((N, C, L), x.dtype),
            grid=grid,
            in_specs=[
                pl.BlockSpec((N, tc, L), lambda i: (0, i, 0)),
                pl.BlockSpec((tc, 1), lambda i: (i, 0)),
                pl.BlockSpec((tc, 1), lambda i: (i, 0)),
            ],
            out_specs=pl.BlockSpec((N, tc, L), lambda i: (0, i, 0)),
            compiler_params=pltpu.CompilerParams(
                dimension_semantics=("parallel",),
                vmem_limit_bytes=vmem_limit,
            ),
        )(x, w, b)

    # ---- split-reduction path: stats pass + affine normalize pass ------------
    tc2, tl = _two_pass_tiles(N, C, L, itemsize, budget)
    if length_tile is not None:
        tl = int(length_tile)
    grid = (pl.cdiv(C, tc2), pl.cdiv(L, tl))

    stats_kernel = functools.partial(_bn_stats_kernel, length=L, length_tile=tl)
    s, sq = pl.pallas_call(
        stats_kernel,
        out_shape=(jax.ShapeDtypeStruct((C, 1), jnp.float32),
                   jax.ShapeDtypeStruct((C, 1), jnp.float32)),
        grid=grid,
        in_specs=[pl.BlockSpec((N, tc2, tl), lambda i, j: (0, i, j))],
        out_specs=(pl.BlockSpec((tc2, 1), lambda i, j: (i, 0)),
                   pl.BlockSpec((tc2, 1), lambda i, j: (i, 0))),
        compiler_params=pltpu.CompilerParams(
            dimension_semantics=("parallel", "arbitrary"),
            vmem_limit_bytes=vmem_limit,
        ),
    )(x)

    # Tiny per-channel math (C elements) stays in plain JAX.
    mean = s * inv_count
    var = jnp.maximum(sq * inv_count - mean * mean, 0.0)
    inv_std = lax.rsqrt(var + eps)
    scale = w * inv_std
    shift = b - mean * scale

    return pl.pallas_call(
        _bn_affine_kernel,
        out_shape=jax.ShapeDtypeStruct((N, C, L), x.dtype),
        grid=grid,
        in_specs=[
            pl.BlockSpec((N, tc2, tl), lambda i, j: (0, i, j)),
            pl.BlockSpec((tc2, 1), lambda i, j: (i, 0)),
            pl.BlockSpec((tc2, 1), lambda i, j: (i, 0)),
        ],
        out_specs=pl.BlockSpec((N, tc2, tl), lambda i, j: (0, i, j)),
        compiler_params=pltpu.CompilerParams(
            dimension_semantics=("parallel", "parallel"),
            vmem_limit_bytes=vmem_limit,
        ),
    )(x, scale, shift)


# ----------------------------------------------------------------------------- test


def _reference(x, weight, bias, eps):
    xf = x.astype(jnp.float32)
    mean = jnp.mean(xf, axis=(0, 2), keepdims=True)
    var = jnp.mean((xf - mean) ** 2, axis=(0, 2), keepdims=True)
    y = (xf - mean) / jnp.sqrt(var + eps)
    y = y * weight.reshape(1, -1, 1) + bias.reshape(1, -1, 1)
    return y.astype(x.dtype)


if __name__ == "__main__":
    key = jax.random.PRNGKey(0)
    kx, kw, kb, kx2 = jax.random.split(key, 4)
    eps = 1e-5

    # Case 1: fused single-pass path (whole channel-tile slab fits VMEM).
    N, C, L = 2, 4, 16
    x = jax.random.normal(kx, (N, C, L), dtype=jnp.float32)
    weight = 1.0 + 0.1 * jax.random.normal(kw, (C,), dtype=jnp.float32)
    bias = 0.1 * jax.random.normal(kb, (C,), dtype=jnp.float32)

    y = jax.block_until_ready(meta_batch_norm1d(x, weight, bias, eps=eps))
    y_ref = _reference(x, weight, bias, eps)
    assert y.shape == (N, C, L)
    assert jnp.allclose(y, y_ref, atol=1e-4, rtol=1e-4), "fused path mismatch"

    # Case 2: force the split-reduction path (tiled + masked length reduction).
    N2, C2, L2 = 2, 4, 200
    x2 = jax.random.normal(kx2, (N2, C2, L2), dtype=jnp.float32)
    y2 = jax.block_until_ready(
        meta_batch_norm1d(x2, weight, bias, eps=eps, two_pass=True, length_tile=128))
    y2_ref = _reference(x2, weight, bias, eps)
    assert y2.shape == (N2, C2, L2)
    assert jnp.allclose(y2, y2_ref, atol=1e-4, rtol=1e-4), "two-pass path mismatch"

    # TODO(synk): running_mean/running_var momentum updates are a training-time
    # buffer side effect and are not materialized here (forward output in
    # training mode does not depend on them).
    print("KERNEL_OK")
</pallas_src>

<mosaic_0001>
module attributes {stable_mosaic.version = 11 : i64} {
  func.func @_bn_fused_kernel(%arg0: i32, %arg1: memref<2x4x16xf32, #tpu.memory_space<vmem>>, %arg2: memref<4x1xf32, #tpu.memory_space<vmem>>, %arg3: memref<4x1xf32, #tpu.memory_space<vmem>>, %arg4: memref<2x4x16xf32, #tpu.memory_space<vmem>>) attributes {dimension_semantics = [#tpu.dimension_semantics<parallel>], iteration_bounds = array<i64: 1>, scalar_prefetch = 0 : i64, scratch_operands = 0 : i64, tpu.core_type = #tpu.core_type<tc>, window_params = [{transform_indices = @transform_0, window_bounds = array<i64: 2, 4, 16>}, {transform_indices = @transform_1, window_bounds = array<i64: 4, 1>}, {transform_indices = @transform_2, window_bounds = array<i64: 4, 1>}, {transform_indices = @transform_3, window_bounds = array<i64: 2, 4, 16>}]} {
    %c0 = arith.constant 0 : index
    %c0_0 = arith.constant 0 : index
    %c0_1 = arith.constant 0 : index
    %0 = vector.load %arg1[%c0, %c0_0, %c0_1] : memref<2x4x16xf32, #tpu.memory_space<vmem>>, vector<2x4x16xf32>
    %cst = arith.constant dense<0.000000e+00> : vector<4x16xf32>
    %1 = vector.multi_reduction <add>, %0, %cst [0] : vector<2x4x16xf32> to vector<4x16xf32>
    %cst_2 = arith.constant dense<0.000000e+00> : vector<4xf32>
    %2 = vector.multi_reduction <add>, %1, %cst_2 [1] : vector<4x16xf32> to vector<4xf32>
    %3 = vector.shape_cast %2 : vector<4xf32> to vector<4x1xf32>
    %4 = arith.mulf %0, %0 : vector<2x4x16xf32>
    %cst_3 = arith.constant dense<0.000000e+00> : vector<4x16xf32>
    %5 = vector.multi_reduction <add>, %4, %cst_3 [0] : vector<2x4x16xf32> to vector<4x16xf32>
    %cst_4 = arith.constant dense<0.000000e+00> : vector<4xf32>
    %6 = vector.multi_reduction <add>, %5, %cst_4 [1] : vector<4x16xf32> to vector<4xf32>
    %7 = vector.shape_cast %6 : vector<4xf32> to vector<4x1xf32>
    %cst_5 = arith.constant 3.125000e-02 : f32
    %8 = vector.broadcast %cst_5 : f32 to vector<4x1xf32>
    %9 = arith.mulf %3, %8 : vector<4x1xf32>
    %cst_6 = arith.constant 3.125000e-02 : f32
    %10 = vector.broadcast %cst_6 : f32 to vector<4x1xf32>
    %11 = arith.mulf %7, %10 : vector<4x1xf32>
    %12 = arith.mulf %9, %9 : vector<4x1xf32>
    %13 = arith.subf %11, %12 : vector<4x1xf32>
    %cst_7 = arith.constant 0.000000e+00 : f32
    %14 = vector.broadcast %cst_7 : f32 to vector<4x1xf32>
    %15 = arith.maximumf %13, %14 : vector<4x1xf32>
    %cst_8 = arith.constant 9.99999974E-6 : f32
    %16 = vector.broadcast %cst_8 : f32 to vector<4x1xf32>
    %17 = arith.addf %15, %16 : vector<4x1xf32>
    %18 = math.rsqrt %17 : vector<4x1xf32>
    %c0_9 = arith.constant 0 : index
    %c0_10 = arith.constant 0 : index
    %19 = vector.load %arg2[%c0_9, %c0_10] : memref<4x1xf32, #tpu.memory_space<vmem>>, vector<4x1xf32>
    %20 = arith.mulf %18, %19 : vector<4x1xf32>
    %c0_11 = arith.constant 0 : index
    %c0_12 = arith.constant 0 : index
    %21 = vector.load %arg3[%c0_11, %c0_12] : memref<4x1xf32, #tpu.memory_space<vmem>>, vector<4x1xf32>
    %22 = arith.mulf %9, %20 : vector<4x1xf32>
    %23 = arith.subf %21, %22 : vector<4x1xf32>
    %24 = vector.shape_cast %20 : vector<4x1xf32> to vector<1x4x1xf32>
    %25 = vector.broadcast %24 : vector<1x4x1xf32> to vector<2x4x16xf32>
    %26 = arith.mulf %0, %25 : vector<2x4x16xf32>
    %27 = vector.shape_cast %23 : vector<4x1xf32> to vector<1x4x1xf32>
    %28 = vector.broadcast %27 : vector<1x4x1xf32> to vector<2x4x16xf32>
    %29 = arith.addf %26, %28 : vector<2x4x16xf32>
    %c0_13 = arith.constant 0 : index
    %c0_14 = arith.constant 0 : index
    %c0_15 = arith.constant 0 : index
    %30 = vector.load %arg4[%c0_13, %c0_14, %c0_15] : memref<2x4x16xf32, #tpu.memory_space<vmem>>, vector<2x4x16xf32>
    tpu.vector_store %arg4[%c0_13, %c0_14, %c0_15], %29 {strides = array<i32>} : memref<2x4x16xf32, #tpu.memory_space<vmem>>, vector<2x4x16xf32>,
    return
  }
  func.func @transform_0(%arg0: i32) -> (i32, i32, i32) {
    %c0_i32 = arith.constant 0 : i32
    %c0_i32_0 = arith.constant 0 : i32
    %c0_i32_1 = arith.constant 0 : i32
    return %c0_i32, %arg0, %c0_i32_0 : i32, i32, i32
  }
  func.func @transform_1(%arg0: i32) -> (i32, i32) {
    %c0_i32 = arith.constant 0 : i32
    %c0_i32_0 = arith.constant 0 : i32
    return %arg0, %c0_i32 : i32, i32
  }
  func.func @transform_2(%arg0: i32) -> (i32, i32) {
    %c0_i32 = arith.constant 0 : i32
    %c0_i32_0 = arith.constant 0 : i32
    return %arg0, %c0_i32 : i32, i32
  }
  func.func @transform_3(%arg0: i32) -> (i32, i32, i32) {
    %c0_i32 = arith.constant 0 : i32
    %c0_i32_0 = arith.constant 0 : i32
    %c0_i32_1 = arith.constant 0 : i32
    return %c0_i32, %arg0, %c0_i32_0 : i32, i32, i32
  }
}

</mosaic_0001>

<bundles_post_ra>
// kernel: tpu_custom_call.1
= control target key start
LH: loop header
LB: loop body
LE: loop exit
PB: predicated region body
PF: predicated region fallthrough
CT: control target
= control target key end

     0   :  { %vm17_vm0 = vcmask 125952   ;;  %s164_s0 = inlined_call_operand.vmem [shape: f32[2,4,16], index: 0, kind: input, shape index: {}]   ;;  %s165_s1 = inlined_call_operand.vmem [shape: f32[4,1], index: 1, kind: input, shape index: {}]   ;;  %s166_s2 = inlined_call_operand.vmem [shape: f32[4,1], index: 2, kind: input, shape index: {}]   ;;  %s167_s3 = inlined_call_operand.hbm [shape: f32[2,4,16], index: 3, kind: output, shape index: {}]  }
   0x1   :  { %v15_v0 = vld [vmem:[%s164_s0] sm:$0xf]  ;;  %v16_v1 = vld [vmem:[%s164_s0 + $0x4] sm:$0xf] }
   0x2   :  { %v18_v2 = vsel %vm17_vm0, %v15_v0, 0.0  ;;  %v19_v3 = vsel %vm17_vm0, %v16_v1, 0.0  ;;  %v24_v4 = vmul.f32 %v15_v0, %v15_v0  ;;  %v25_v5 = vmul.f32 %v16_v1, %v16_v1 }
   0x3   :  { %8 = vsyncpa [#allocation3], 0  ;;  %v20_v6 = vadd.f32 %v19_v3, %v18_v2  ;;  %v108_v12 = vmov 0   ;;  %v39_v21 = vld [vmem:[%s165_s1] sm:$0xf]  ;;  %s109_s19 = smov [#allocation2]  }
   0x4   :  { %v26_v7 = vsel %vm17_vm0, %v24_v4, 0.0  ;;  %v27_v8 = vsel %vm17_vm0, %v25_v5, 0.0  ;;  %80 = vset.pattern.permute.xlu1 %v108_v12  ;;  %81 = vset.pattern.permute.xlu0 %v108_v12  ;;  %v41_v24 = vld [vmem:[%s166_s2] sm:$0xf]  ;;  %s65_s20 = sshll.u32 %s109_s19, 4  ;;  %s66_s20 = int_to_ptr.vmem [resolvable:$true] %s65_s20 }
   0x5   :  { %v21_v9 = vsel %vm17_vm0, %v20_v6, 0.0  ;;  %v28_v10 = vadd.f32 %v27_v8, %v26_v7  ;;  %s84_s1 = scalar_lea.vmem %s66_s20, 128  ;;  %p89_p1 = scmp.lt.s32.totalorder %s66_s20, %s66_s20 }
   0x6   :  { %22 = vadd.xlane.f32.xlu0 %v21_v9  ;;  %p85_p0 = scmp.ne.s32.totalorder %s66_s20, %s84_s1  ;;  %p90_p2 = scmp.lt.s32.totalorder %s84_s1, %s84_s1 }
   0x7   :  { %v29_v11 = vsel %vm17_vm0, %v28_v10, 0.0 }
   0x8   :  { %p91_p3 = por %p90_p2, %p89_p1 }
   0xa   :  { %30 = vadd.xlane.f32.xlu0 %v29_v11  ;;  %p92_p4 = pnand %p91_p3, %p85_p0 }
  0x93   :  { %v23_v13 = vpop.xlane.xlu0 %22 }
  0x94   :  { %v32_v14 = vmul.f32 0.03125, %v23_v13 }
  0x96   :  { %v34_v16 = vmul.f32 %v32_v14, %v32_v14 }
  0x97   :  { %v31_v15 = vpop.xlane.xlu0 %30 }
  0x98   :  { %v33_v17 = vmul.f32 0.03125, %v31_v15 }
  0x9a   :  { %v35_v18 = vsub.f32 %v33_v17, %v34_v16 }
  0x9c   :  { %v36_v19 = vmax.f32 %v35_v18, 0.0 }
  0x9e   :  { %v37_v20 = vadd.f32 1e-05, %v36_v19 }
  0xa0   :  { %82 = vrsqrt.f32 %v37_v20 }
  0xaa   :  { %v83_v22 = vpop.eup %82 }
  0xab   :  { %v40_v23 = vmul.f32 %v83_v22, %v39_v21 }
  0xad   :  { %46 = vperm.xlu1 %80, %v40_v23   ;;  %v42_v25 = vmul.f32 %v40_v23, %v32_v14 }
  0xaf   :  { %v43_v26 = vsub.f32 %v41_v24, %v42_v25 }
  0xb1   :  { %53 = vperm.xlu1 %80, %v43_v26  }
 0x12c   :  { %v47_v27 = vpop.permute.xlu1 %46 }
 0x12d   :  { %v49_v28 = vmul.f32 %v47_v27, %v15_v0  ;;  %v50_v29 = vmul.f32 %v47_v27, %v16_v1 }
 0x130   :  { %v54_v30 = vpop.permute.xlu1 %53 }
 0x131   :  { %v56_v31 = vadd.f32 %v54_v30, %v49_v28  ;;  %v57_v32 = vadd.f32 %v54_v30, %v50_v29 }
 0x133   :  { %58 = vst.msk [vmem:[#allocation2] sm:$0xf] %vm17_vm0, %v56_v31  ;;  %59 = vst.msk [vmem:[#allocation2 + $0x4] sm:$0xf] %vm17_vm0, %v57_v32 }
 0x134   :  { %95 = shalt.err (!%p92_p4)
}
 0x135   :  { %s96_s22 = scalar_lea.hbm %s167_s3, 128 }
 0x136   :  { %p97_p5 = scmp.ne.s32.totalorder %s167_s3, %s96_s22  ;;  %p100_p6 = scmp.lt.u32.totalorder %s96_s22, %s167_s3 }
 0x138   :  { %p102_p7 = pnand %p100_p6, %p97_p5 }
 0x13a   :  { %105 = shalt.err (!%p102_p7)
}
 0x13b   :  { %s110_s27 = smov 64   ;;  %s111_s28 = smov 4  }
 0x13c   :  { %71 = dma.vmem_to_hbm [thread:$0]  %s66_s20, 128, %s167_s3, [#allocation3], %s110_s27, %s110_s27, %s111_s28  }
 0x13d   :  { %106 = dma.done.wait [#allocation3], 128  }
 0x13e   :  { %107 = vsyncadd [#allocation3], 4294967168 }
 0x13f   :  { %75 = vsyncpa [#allocation3], 1 }

</bundles_post_ra>
